<compile_context>
chip_gen: v5e
topology: v5e:2x2
jax: 0.10.0
libtpu: 0.0.40
codegen_flags: <defaults>
</compile_context>

<pallas_src>
import functools

import jax
import jax.numpy as jnp
from jax.experimental import pallas as pl
from jax.experimental.pallas import tpu as pltpu


# ----------------------------------------------------------------------------
# Kernel: actor and critic MLPs fused in one body, two native outputs.
#   logit = (ReLU(ReLU(xl@lw1+lb1)@lw2+lb2)) @ pw + pb
#   value = (ReLU(ReLU(xg@gw1+gb1)@gw2+gb2)) @ vw + vb
# ----------------------------------------------------------------------------
def _ctde_kernel(xl_ref, xg_ref,
                 lw1_ref, lb1_ref, lw2_ref, lb2_ref, pw_ref, pb_ref,
                 gw1_ref, gb1_ref, gw2_ref, gb2_ref, vw_ref, vb_ref,
                 logit_ref, value_ref):
    # ---- actor (policy) path ----
    xl = xl_ref[...].astype(jnp.bfloat16)
    h = jnp.dot(xl, lw1_ref[...], preferred_element_type=jnp.float32) + lb1_ref[...]
    h = jnp.maximum(h, 0.0).astype(jnp.bfloat16)
    h = jnp.dot(h, lw2_ref[...], preferred_element_type=jnp.float32) + lb2_ref[...]
    h = jnp.maximum(h, 0.0).astype(jnp.bfloat16)
    logit = jnp.dot(h, pw_ref[...], preferred_element_type=jnp.float32) + pb_ref[...]
    logit_ref[...] = logit.astype(logit_ref.dtype)

    # ---- critic (value) path ----
    xg = xg_ref[...].astype(jnp.bfloat16)
    g = jnp.dot(xg, gw1_ref[...], preferred_element_type=jnp.float32) + gb1_ref[...]
    g = jnp.maximum(g, 0.0).astype(jnp.bfloat16)
    g = jnp.dot(g, gw2_ref[...], preferred_element_type=jnp.float32) + gb2_ref[...]
    g = jnp.maximum(g, 0.0).astype(jnp.bfloat16)
    value = jnp.dot(g, vw_ref[...], preferred_element_type=jnp.float32) + vb_ref[...]
    value_ref[...] = value.astype(value_ref.dtype)


def _run_ctde(xl, xg, pk, *, row_tile=4096):
    """One pallas_call over the fused actor+critic MLP, tiled over rows."""
    rows, L = xl.shape
    G = xg.shape[1]
    lw1, lb1 = pk["local_l1"]
    lw2, lb2 = pk["local_l2"]
    gw1, gb1 = pk["global_l1"]
    gw2, gb2 = pk["global_l2"]
    pw, pb = pk["policy_head"]
    vw, vb = pk["value_head"]
    A = pw.shape[1]

    # Tile selection: single full block for small batches; otherwise cap the tile
    # so there are always >= 2 grid blocks (v7x megacore) and it is 8-aligned.
    if rows <= 1024:
        tile = rows
    else:
        half = ((pl.cdiv(rows, 2) + 7) // 8) * 8
        tile = min(row_tile, half)
    grid_rows = pl.cdiv(rows, tile)

    # Advisory cost so XLA does not treat the custom call as opaque.
    flops = 2 * rows * (L * 32 + 32 * 64 + 64 * A + G * 32 + 32 * 64 + 64 * 1)
    bytes_accessed = (
        4 * rows * (L + G)                                   # f32 activations in
        + 4 * rows * (A + 1)                                 # f32 outputs
        + 2 * (L * 32 + 32 * 64 + 64 * A + G * 32 + 32 * 64 + 64)   # bf16 weights
        + 4 * (32 + 64 + A + 32 + 64 + 1)                    # f32 biases
    )

    def _w_spec(arr):  # weights / biases: full block, VMEM-resident across grid
        return pl.BlockSpec(arr.shape, lambda i: (0, 0))

    logit, value = pl.pallas_call(
        _ctde_kernel,
        out_shape=(jax.ShapeDtypeStruct((rows, A), jnp.float32),
                   jax.ShapeDtypeStruct((rows, 1), jnp.float32)),
        grid=(grid_rows,),
        in_specs=[
            pl.BlockSpec((tile, L), lambda i: (i, 0)),   # local obs rows
            pl.BlockSpec((tile, G), lambda i: (i, 0)),   # global obs rows
            _w_spec(lw1), _w_spec(lb1), _w_spec(lw2), _w_spec(lb2),
            _w_spec(pw), _w_spec(pb),
            _w_spec(gw1), _w_spec(gb1), _w_spec(gw2), _w_spec(gb2),
            _w_spec(vw), _w_spec(vb),
        ],
        out_specs=(pl.BlockSpec((tile, A), lambda i: (i, 0)),
                   pl.BlockSpec((tile, 1), lambda i: (i, 0))),
        compiler_params=pltpu.CompilerParams(
            dimension_semantics=("parallel",)),
        cost_estimate=pl.CostEstimate(
            flops=flops, transcendentals=0, bytes_accessed=bytes_accessed),
    )(xl, xg, lw1, lb1, lw2, lb2, pw, pb, gw1, gb1, gw2, gb2, vw, vb)

    return logit, value


# ----------------------------------------------------------------------------
# Parameters (mimicking nn.Linear init) + one-time bf16 packing
# ----------------------------------------------------------------------------
def _init_linear(key, in_features, out_features):
    kw, kb = jax.random.split(key)
    bound = 1.0 / jnp.sqrt(jnp.float32(in_features))
    w = jax.random.uniform(kw, (in_features, out_features), jnp.float32, -bound, bound)
    b = jax.random.uniform(kb, (1, out_features), jnp.float32, -bound, bound)
    return w, b


def init_ctde_params(key, local_obs_shape, global_obs_shape, action_shape):
    keys = jax.random.split(key, 6)
    return {
        "local_l1": _init_linear(keys[0], local_obs_shape, 32),
        "local_l2": _init_linear(keys[1], 32, 64),
        "global_l1": _init_linear(keys[2], global_obs_shape, 32),
        "global_l2": _init_linear(keys[3], 32, 64),
        "policy_head": _init_linear(keys[4], 64, action_shape),
        "value_head": _init_linear(keys[5], 64, 1),
    }


def pack_ctde_params(params):
    """One-time packing: weights to bf16 (native MXU), biases kept f32."""
    def cvt(p):
        w, b = p
        return w.astype(jnp.bfloat16), b.astype(jnp.float32)
    return {k: cvt(v) for k, v in params.items()}


# ----------------------------------------------------------------------------
# Forward
# ----------------------------------------------------------------------------
@jax.jit
def ctde_forward(packed, local_obs, global_obs):
    """
    local_obs : (B, A, L) float32
    global_obs: (B, A, G) float32   (per-agent global state variant)
    returns {'logit': (B, A, action_shape), 'value': (B, A, 1)}
    """
    # TODO(synk): shared-global variant (global_obs of shape (B, G) -> value (B, 1))
    # is not wired through this fused kernel; per-agent (B, A, G) only.
    B, A_agents, L = local_obs.shape
    G = global_obs.shape[-1]
    rows = B * A_agents

    xl = local_obs.reshape(rows, L)       # free reshapes, no concat / pad
    xg = global_obs.reshape(rows, G)

    logit, value = _run_ctde(xl, xg, packed)
    return {
        "logit": logit.reshape(B, A_agents, -1),
        "value": value.reshape(B, A_agents, 1),
    }


# ----------------------------------------------------------------------------
# Pure-JAX f32 reference (unpacked params) for correctness check
# ----------------------------------------------------------------------------
def _reference_forward(params, local_obs, global_obs):
    def mlp(x, p1, p2, p3):
        h = jnp.maximum(x @ p1[0] + p1[1], 0.0)
        h = jnp.maximum(h @ p2[0] + p2[1], 0.0)
        return h @ p3[0] + p3[1]

    B, A_agents, L = local_obs.shape
    logit = mlp(local_obs.reshape(B * A_agents, L), params["local_l1"],
                params["local_l2"], params["policy_head"]).reshape(B, A_agents, -1)
    value = mlp(global_obs.reshape(B * A_agents, -1), params["global_l1"],
                params["global_l2"], params["value_head"]).reshape(B, A_agents, 1)
    return {"logit": logit, "value": value}


def _check(out, ref, B, A_agents, action_shape, tol):
    assert out["logit"].shape == (B, A_agents, action_shape)
    assert out["value"].shape == (B, A_agents, 1)
    assert jnp.allclose(out["logit"], ref["logit"], atol=tol, rtol=tol), (
        float(jnp.max(jnp.abs(out["logit"] - ref["logit"]))))
    assert jnp.allclose(out["value"], ref["value"], atol=tol, rtol=tol), (
        float(jnp.max(jnp.abs(out["value"] - ref["value"]))))


if __name__ == "__main__":
    local_obs_shape = 16   # L
    global_obs_shape = 32  # G (per-agent global state variant, shape (B, A, G))
    action_shape = 8

    key = jax.random.PRNGKey(0)
    k_params, k_l0, k_g0, k_l1, k_g1 = jax.random.split(key, 5)

    params = init_ctde_params(k_params, local_obs_shape, global_obs_shape, action_shape)
    packed = pack_ctde_params(params)

    # --- small case: single full-array block ---
    B, agent_num = 2, 4
    local_obs = jax.random.normal(k_l0, (B, agent_num, local_obs_shape), jnp.float32)
    global_obs = jax.random.normal(k_g0, (B, agent_num, global_obs_shape), jnp.float32)
    out = ctde_forward(packed, local_obs, global_obs)
    jax.block_until_ready(out)
    _check(out, _reference_forward(params, local_obs, global_obs),
           B, agent_num, action_shape, tol=2e-2)

    # --- larger case: exercises the tiled grid + ragged last block (clipped writes) ---
    B2, agent_num2 = 300, 5   # rows = 1500 > 1024 -> 2 grid blocks, last one ragged
    local_obs2 = jax.random.normal(k_l1, (B2, agent_num2, local_obs_shape), jnp.float32)
    global_obs2 = jax.random.normal(k_g1, (B2, agent_num2, global_obs_shape), jnp.float32)
    out2 = ctde_forward(packed, local_obs2, global_obs2)
    jax.block_until_ready(out2)
    _check(out2, _reference_forward(params, local_obs2, global_obs2),
           B2, agent_num2, action_shape, tol=2e-2)

    print("KERNEL_OK")
</pallas_src>

<mosaic_0001>
module attributes {stable_mosaic.version = 11 : i64} {
  func.func @_ctde_kernel(%arg0: i32, %arg1: memref<8x16xf32, #tpu.memory_space<vmem>>, %arg2: memref<8x32xf32, #tpu.memory_space<vmem>>, %arg3: memref<16x32xbf16, #tpu.memory_space<vmem>>, %arg4: memref<1x32xf32, #tpu.memory_space<vmem>>, %arg5: memref<32x64xbf16, #tpu.memory_space<vmem>>, %arg6: memref<1x64xf32, #tpu.memory_space<vmem>>, %arg7: memref<64x8xbf16, #tpu.memory_space<vmem>>, %arg8: memref<1x8xf32, #tpu.memory_space<vmem>>, %arg9: memref<32x32xbf16, #tpu.memory_space<vmem>>, %arg10: memref<1x32xf32, #tpu.memory_space<vmem>>, %arg11: memref<32x64xbf16, #tpu.memory_space<vmem>>, %arg12: memref<1x64xf32, #tpu.memory_space<vmem>>, %arg13: memref<64x1xbf16, #tpu.memory_space<vmem>>, %arg14: memref<1x1xf32, #tpu.memory_space<vmem>>, %arg15: memref<8x8xf32, #tpu.memory_space<vmem>>, %arg16: memref<8x1xf32, #tpu.memory_space<vmem>>) attributes {dimension_semantics = [#tpu.dimension_semantics<parallel>], iteration_bounds = array<i64: 1>, scalar_prefetch = 0 : i64, scratch_operands = 0 : i64, tpu.core_type = #tpu.core_type<tc>, window_params = [{transform_indices = @transform_0, window_bounds = array<i64: 8, 16>}, {transform_indices = @transform_1, window_bounds = array<i64: 8, 32>}, {pipeline_mode = #tpu.pipeline_mode<synchronous>, transform_indices = @transform_2, window_bounds = array<i64: 16, 32>}, {pipeline_mode = #tpu.pipeline_mode<synchronous>, transform_indices = @transform_3, window_bounds = array<i64: 1, 32>}, {pipeline_mode = #tpu.pipeline_mode<synchronous>, transform_indices = @transform_4, window_bounds = array<i64: 32, 64>}, {pipeline_mode = #tpu.pipeline_mode<synchronous>, transform_indices = @transform_5, window_bounds = array<i64: 1, 64>}, {pipeline_mode = #tpu.pipeline_mode<synchronous>, transform_indices = @transform_6, window_bounds = array<i64: 64, 8>}, {pipeline_mode = #tpu.pipeline_mode<synchronous>, transform_indices = @transform_7, window_bounds = array<i64: 1, 8>}, {pipeline_mode = #tpu.pipeline_mode<synchronous>, transform_indices = @transform_8, window_bounds = array<i64: 32, 32>}, {pipeline_mode = #tpu.pipeline_mode<synchronous>, transform_indices = @transform_9, window_bounds = array<i64: 1, 32>}, {pipeline_mode = #tpu.pipeline_mode<synchronous>, transform_indices = @transform_10, window_bounds = array<i64: 32, 64>}, {pipeline_mode = #tpu.pipeline_mode<synchronous>, transform_indices = @transform_11, window_bounds = array<i64: 1, 64>}, {pipeline_mode = #tpu.pipeline_mode<synchronous>, transform_indices = @transform_12, window_bounds = array<i64: 64, 1>}, {pipeline_mode = #tpu.pipeline_mode<synchronous>, transform_indices = @transform_13, window_bounds = array<i64: 1, 1>}, {transform_indices = @transform_14, window_bounds = array<i64: 8, 8>}, {transform_indices = @transform_15, window_bounds = array<i64: 8, 1>}]} {
    %c0 = arith.constant 0 : index
    %c0_0 = arith.constant 0 : index
    %0 = vector.load %arg1[%c0, %c0_0] : memref<8x16xf32, #tpu.memory_space<vmem>>, vector<8x16xf32>
    %1 = arith.truncf %0 : vector<8x16xf32> to vector<8x16xbf16>
    %c0_1 = arith.constant 0 : index
    %c0_2 = arith.constant 0 : index
    %2 = vector.load %arg3[%c0_1, %c0_2] : memref<16x32xbf16, #tpu.memory_space<vmem>>, vector<16x32xbf16>
    %cst = arith.constant dense<0.000000e+00> : vector<8x32xf32>
    %3 = tpu.matmul %1, %2, %cst {dimension_numbers = #tpu.dot_dimension_numbers<[1], [0], [0], [1], [0, 0, 1, 1], [], []>} : vector<8x16xbf16>, vector<16x32xbf16>, vector<8x32xf32> -> vector<8x32xf32>
    %c0_3 = arith.constant 0 : index
    %c0_4 = arith.constant 0 : index
    %4 = vector.load %arg4[%c0_3, %c0_4] : memref<1x32xf32, #tpu.memory_space<vmem>>, vector<1x32xf32>
    %5 = vector.broadcast %4 : vector<1x32xf32> to vector<8x32xf32>
    %6 = arith.addf %3, %5 : vector<8x32xf32>
    %cst_5 = arith.constant 0.000000e+00 : f32
    %7 = vector.broadcast %cst_5 : f32 to vector<8x32xf32>
    %8 = arith.maximumf %6, %7 : vector<8x32xf32>
    %9 = arith.truncf %8 : vector<8x32xf32> to vector<8x32xbf16>
    %c0_6 = arith.constant 0 : index
    %c0_7 = arith.constant 0 : index
    %10 = vector.load %arg5[%c0_6, %c0_7] : memref<32x64xbf16, #tpu.memory_space<vmem>>, vector<32x64xbf16>
    %cst_8 = arith.constant dense<0.000000e+00> : vector<8x64xf32>
    %11 = tpu.matmul %9, %10, %cst_8 {dimension_numbers = #tpu.dot_dimension_numbers<[1], [0], [0], [1], [0, 0, 1, 1], [], []>} : vector<8x32xbf16>, vector<32x64xbf16>, vector<8x64xf32> -> vector<8x64xf32>
    %c0_9 = arith.constant 0 : index
    %c0_10 = arith.constant 0 : index
    %12 = vector.load %arg6[%c0_9, %c0_10] : memref<1x64xf32, #tpu.memory_space<vmem>>, vector<1x64xf32>
    %13 = vector.broadcast %12 : vector<1x64xf32> to vector<8x64xf32>
    %14 = arith.addf %11, %13 : vector<8x64xf32>
    %cst_11 = arith.constant 0.000000e+00 : f32
    %15 = vector.broadcast %cst_11 : f32 to vector<8x64xf32>
    %16 = arith.maximumf %14, %15 : vector<8x64xf32>
    %17 = arith.truncf %16 : vector<8x64xf32> to vector<8x64xbf16>
    %c0_12 = arith.constant 0 : index
    %c0_13 = arith.constant 0 : index
    %18 = vector.load %arg7[%c0_12, %c0_13] : memref<64x8xbf16, #tpu.memory_space<vmem>>, vector<64x8xbf16>
    %cst_14 = arith.constant dense<0.000000e+00> : vector<8x8xf32>
    %19 = tpu.matmul %17, %18, %cst_14 {dimension_numbers = #tpu.dot_dimension_numbers<[1], [0], [0], [1], [0, 0, 1, 1], [], []>} : vector<8x64xbf16>, vector<64x8xbf16>, vector<8x8xf32> -> vector<8x8xf32>
    %c0_15 = arith.constant 0 : index
    %c0_16 = arith.constant 0 : index
    %20 = vector.load %arg8[%c0_15, %c0_16] : memref<1x8xf32, #tpu.memory_space<vmem>>, vector<1x8xf32>
    %21 = vector.broadcast %20 : vector<1x8xf32> to vector<8x8xf32>
    %22 = arith.addf %19, %21 : vector<8x8xf32>
    %c0_17 = arith.constant 0 : index
    %c0_18 = arith.constant 0 : index
    %23 = vector.load %arg15[%c0_17, %c0_18] : memref<8x8xf32, #tpu.memory_space<vmem>>, vector<8x8xf32>
    tpu.vector_store %arg15[%c0_17, %c0_18], %22 {strides = array<i32>} : memref<8x8xf32, #tpu.memory_space<vmem>>, vector<8x8xf32>,
    %c0_19 = arith.constant 0 : index
    %c0_20 = arith.constant 0 : index
    %24 = vector.load %arg2[%c0_19, %c0_20] : memref<8x32xf32, #tpu.memory_space<vmem>>, vector<8x32xf32>
    %25 = arith.truncf %24 : vector<8x32xf32> to vector<8x32xbf16>
    %c0_21 = arith.constant 0 : index
    %c0_22 = arith.constant 0 : index
    %26 = vector.load %arg9[%c0_21, %c0_22] : memref<32x32xbf16, #tpu.memory_space<vmem>>, vector<32x32xbf16>
    %cst_23 = arith.constant dense<0.000000e+00> : vector<8x32xf32>
    %27 = tpu.matmul %25, %26, %cst_23 {dimension_numbers = #tpu.dot_dimension_numbers<[1], [0], [0], [1], [0, 0, 1, 1], [], []>} : vector<8x32xbf16>, vector<32x32xbf16>, vector<8x32xf32> -> vector<8x32xf32>
    %c0_24 = arith.constant 0 : index
    %c0_25 = arith.constant 0 : index
    %28 = vector.load %arg10[%c0_24, %c0_25] : memref<1x32xf32, #tpu.memory_space<vmem>>, vector<1x32xf32>
    %29 = vector.broadcast %28 : vector<1x32xf32> to vector<8x32xf32>
    %30 = arith.addf %27, %29 : vector<8x32xf32>
    %cst_26 = arith.constant 0.000000e+00 : f32
    %31 = vector.broadcast %cst_26 : f32 to vector<8x32xf32>
    %32 = arith.maximumf %30, %31 : vector<8x32xf32>
    %33 = arith.truncf %32 : vector<8x32xf32> to vector<8x32xbf16>
    %c0_27 = arith.constant 0 : index
    %c0_28 = arith.constant 0 : index
    %34 = vector.load %arg11[%c0_27, %c0_28] : memref<32x64xbf16, #tpu.memory_space<vmem>>, vector<32x64xbf16>
    %cst_29 = arith.constant dense<0.000000e+00> : vector<8x64xf32>
    %35 = tpu.matmul %33, %34, %cst_29 {dimension_numbers = #tpu.dot_dimension_numbers<[1], [0], [0], [1], [0, 0, 1, 1], [], []>} : vector<8x32xbf16>, vector<32x64xbf16>, vector<8x64xf32> -> vector<8x64xf32>
    %c0_30 = arith.constant 0 : index
    %c0_31 = arith.constant 0 : index
    %36 = vector.load %arg12[%c0_30, %c0_31] : memref<1x64xf32, #tpu.memory_space<vmem>>, vector<1x64xf32>
    %37 = vector.broadcast %36 : vector<1x64xf32> to vector<8x64xf32>
    %38 = arith.addf %35, %37 : vector<8x64xf32>
    %cst_32 = arith.constant 0.000000e+00 : f32
    %39 = vector.broadcast %cst_32 : f32 to vector<8x64xf32>
    %40 = arith.maximumf %38, %39 : vector<8x64xf32>
    %41 = arith.truncf %40 : vector<8x64xf32> to vector<8x64xbf16>
    %c0_33 = arith.constant 0 : index
    %c0_34 = arith.constant 0 : index
    %42 = vector.load %arg13[%c0_33, %c0_34] : memref<64x1xbf16, #tpu.memory_space<vmem>>, vector<64x1xbf16>
    %cst_35 = arith.constant dense<0.000000e+00> : vector<8x1xf32>
    %43 = tpu.matmul %41, %42, %cst_35 {dimension_numbers = #tpu.dot_dimension_numbers<[1], [0], [0], [1], [0, 0, 1, 1], [], []>} : vector<8x64xbf16>, vector<64x1xbf16>, vector<8x1xf32> -> vector<8x1xf32>
    %c0_36 = arith.constant 0 : index
    %c0_37 = arith.constant 0 : index
    %44 = vector.load %arg14[%c0_36, %c0_37] : memref<1x1xf32, #tpu.memory_space<vmem>>, vector<1x1xf32>
    %45 = vector.broadcast %44 : vector<1x1xf32> to vector<8x1xf32>
    %46 = arith.addf %43, %45 : vector<8x1xf32>
    %c0_38 = arith.constant 0 : index
    %c0_39 = arith.constant 0 : index
    %47 = vector.load %arg16[%c0_38, %c0_39] : memref<8x1xf32, #tpu.memory_space<vmem>>, vector<8x1xf32>
    tpu.vector_store %arg16[%c0_38, %c0_39], %46 {strides = array<i32>} : memref<8x1xf32, #tpu.memory_space<vmem>>, vector<8x1xf32>,
    return
  }
  func.func @transform_0(%arg0: i32) -> (i32, i32) {
    %c0_i32 = arith.constant 0 : i32
    %c0_i32_0 = arith.constant 0 : i32
    return %arg0, %c0_i32 : i32, i32
  }
  func.func @transform_1(%arg0: i32) -> (i32, i32) {
    %c0_i32 = arith.constant 0 : i32
    %c0_i32_0 = arith.constant 0 : i32
    return %arg0, %c0_i32 : i32, i32
  }
  func.func @transform_2(%arg0: i32) -> (i32, i32) {
    %c0_i32 = arith.constant 0 : i32
    %c0_i32_0 = arith.constant 0 : i32
    %c0_i32_1 = arith.constant 0 : i32
    return %c0_i32, %c0_i32_0 : i32, i32
  }
  func.func @transform_3(%arg0: i32) -> (i32, i32) {
    %c0_i32 = arith.constant 0 : i32
    %c0_i32_0 = arith.constant 0 : i32
    %c0_i32_1 = arith.constant 0 : i32
    return %c0_i32, %c0_i32_0 : i32, i32
  }
  func.func @transform_4(%arg0: i32) -> (i32, i32) {
    %c0_i32 = arith.constant 0 : i32
    %c0_i32_0 = arith.constant 0 : i32
    %c0_i32_1 = arith.constant 0 : i32
    return %c0_i32, %c0_i32_0 : i32, i32
  }
  func.func @transform_5(%arg0: i32) -> (i32, i32) {
    %c0_i32 = arith.constant 0 : i32
    %c0_i32_0 = arith.constant 0 : i32
    %c0_i32_1 = arith.constant 0 : i32
    return %c0_i32, %c0_i32_0 : i32, i32
  }
  func.func @transform_6(%arg0: i32) -> (i32, i32) {
    %c0_i32 = arith.constant 0 : i32
    %c0_i32_0 = arith.constant 0 : i32
    %c0_i32_1 = arith.constant 0 : i32
    return %c0_i32, %c0_i32_0 : i32, i32
  }
  func.func @transform_7(%arg0: i32) -> (i32, i32) {
    %c0_i32 = arith.constant 0 : i32
    %c0_i32_0 = arith.constant 0 : i32
    %c0_i32_1 = arith.constant 0 : i32
    return %c0_i32, %c0_i32_0 : i32, i32
  }
  func.func @transform_8(%arg0: i32) -> (i32, i32) {
    %c0_i32 = arith.constant 0 : i32
    %c0_i32_0 = arith.constant 0 : i32
    %c0_i32_1 = arith.constant 0 : i32
    return %c0_i32, %c0_i32_0 : i32, i32
  }
  func.func @transform_9(%arg0: i32) -> (i32, i32) {
    %c0_i32 = arith.constant 0 : i32
    %c0_i32_0 = arith.constant 0 : i32
    %c0_i32_1 = arith.constant 0 : i32
    return %c0_i32, %c0_i32_0 : i32, i32
  }
  func.func @transform_10(%arg0: i32) -> (i32, i32) {
    %c0_i32 = arith.constant 0 : i32
    %c0_i32_0 = arith.constant 0 : i32
    %c0_i32_1 = arith.constant 0 : i32
    return %c0_i32, %c0_i32_0 : i32, i32
  }
  func.func @transform_11(%arg0: i32) -> (i32, i32) {
    %c0_i32 = arith.constant 0 : i32
    %c0_i32_0 = arith.constant 0 : i32
    %c0_i32_1 = arith.constant 0 : i32
    return %c0_i32, %c0_i32_0 : i32, i32
  }
  func.func @transform_12(%arg0: i32) -> (i32, i32) {
    %c0_i32 = arith.constant 0 : i32
    %c0_i32_0 = arith.constant 0 : i32
    %c0_i32_1 = arith.constant 0 : i32
    return %c0_i32, %c0_i32_0 : i32, i32
  }
  func.func @transform_13(%arg0: i32) -> (i32, i32) {
    %c0_i32 = arith.constant 0 : i32
    %c0_i32_0 = arith.constant 0 : i32
    %c0_i32_1 = arith.constant 0 : i32
    return %c0_i32, %c0_i32_0 : i32, i32
  }
  func.func @transform_14(%arg0: i32) -> (i32, i32) {
    %c0_i32 = arith.constant 0 : i32
    %c0_i32_0 = arith.constant 0 : i32
    return %arg0, %c0_i32 : i32, i32
  }
  func.func @transform_15(%arg0: i32) -> (i32, i32) {
    %c0_i32 = arith.constant 0 : i32
    %c0_i32_0 = arith.constant 0 : i32
    return %arg0, %c0_i32 : i32, i32
  }
}

</mosaic_0001>

<bundles_post_ra>
// kernel: ctde_forward.1
= control target key start
LH: loop header
LB: loop body
LE: loop exit
PB: predicated region body
PF: predicated region fallthrough
CT: control target
= control target key end

     0   :  { %s730_s0 = inlined_call_operand.vmem [shape: f32[8,16], index: 0, kind: input, shape index: {}]   ;;  %s731_s1 = inlined_call_operand.vmem [shape: f32[8,32], index: 1, kind: input, shape index: {}]   ;;  %s732_s2 = inlined_call_operand.vmem [shape: bf16[16,32], index: 2, kind: input, shape index: {}]   ;;  %s733_s3 = inlined_call_operand.hbm [shape: f32[1,32], index: 3, kind: input, shape index: {}]   ;;  %s734_s4 = inlined_call_operand.vmem [shape: bf16[32,64], index: 4, kind: input, shape index: {}]   ;;  %s735_s5 = inlined_call_operand.vmem [shape: f32[1,64], index: 5, kind: input, shape index: {}]   ;;  %s736_s6 = inlined_call_operand.vmem [shape: bf16[64,8], index: 6, kind: input, shape index: {}]   ;;  %s737_s7 = inlined_call_operand.vmem [shape: f32[1,8], index: 7, kind: input, shape index: {}]   ;;  %s738_s8 = inlined_call_operand.vmem [shape: bf16[32,32], index: 8, kind: input, shape index: {}]   ;;  %s739_s9 = inlined_call_operand.hbm [shape: f32[1,32], index: 9, kind: input, shape index: {}]   ;;  %s740_s10 = inlined_call_operand.vmem [shape: bf16[32,64], index: 10, kind: input, shape index: {}]   ;;  %s741_s11 = inlined_call_operand.hbm [shape: f32[1,64], index: 11, kind: input, shape index: {}]   ;;  %s742_s12 = inlined_call_operand.vmem [shape: bf16[64,1], index: 12, kind: input, shape index: {}]   ;;  %s743_s13 = inlined_call_operand.<no memory space> [shape: f32[1,1], index: 13, kind: input, shape index: {}]   ;;  %s744_s14 = inlined_call_operand.hbm [shape: f32[8,8], index: 14, kind: output, shape index: {0}]   ;;  %s745_s15 = inlined_call_operand.vmem [shape: f32[8,1], index: 15, kind: output, shape index: {1}]  }
   0x1   :  { %v21_v0 = vstv %s743_s13 }
   0x2   :  { %22 = vst [vmem:[#allocation2] sm:$0x1] %v21_v0 }
   0x3   :  { %23 = vsyncpa [#allocation4], 0 }
   0x4   :  { %24 = vsyncpa [#allocation7], 0  ;;  %s58_s22 = sshll.u32 %s739_s9, 4  ;;  %s59_s22 = int_to_ptr.hbm [resolvable:$true] %s58_s22 }
   0x5   :  { %25 = vsyncpa [#allocation5], 0  ;;  %s568_s23 = smov [#allocation6]   ;;  %s37_s27 = sshll.u32 %s733_s3, 4  ;;  %s38_s27 = int_to_ptr.hbm [resolvable:$true] %s37_s27 }
   0x6   :  { %s60_s24 = sshll.u32 %s568_s23, 4  ;;  %s569_s28 = smov [#allocation3]   ;;  %s61_s24 = int_to_ptr.vmem [resolvable:$true] %s60_s24 }
   0x7   :  { %63 = dma.hbm_to_vmem [thread:$0]  %s59_s22, 16, %s61_s24, [#allocation7]  }
   0x8   :  { %s39_s13 = sshll.u32 %s569_s28, 4  ;;  %s71_s16 = sshll.u32 %s741_s11, 4  ;;  %s40_s13 = int_to_ptr.vmem [resolvable:$true] %s39_s13  ;;  %s72_s16 = int_to_ptr.hbm [resolvable:$true] %s71_s16 }
   0x9   :  { %42 = dma.hbm_to_vmem [thread:$0]  %s38_s27, 16, %s40_s13, [#allocation4]  }
   0xa   :  { %s570_s9 = smov [#allocation8]  }
   0xb   :  { %s73_s17 = sshll.u32 %s570_s9, 4  ;;  %s74_s17 = int_to_ptr.vmem [resolvable:$true] %s73_s17 }
   0xc   :  { %76 = dma.hbm_to_vmem [thread:$0]  %s72_s16, 16, %s74_s17, [#allocation7]  }
   0xd   :  { %562 = dma.done.wait [#allocation4], 16  }
   0xe   :  { %563 = vsyncadd [#allocation4], 4294967280 }
   0xf   :  { %564 = dma.done.wait [#allocation7], 32  }
  0x10   :  { %565 = vsyncadd [#allocation7], 4294967264  ;;  %v441_v1 = vld [vmem:[%s732_s2] sm:$0xff]  ;;  %v449_v2 = vld [vmem:[%s738_s8 + $0x8] sm:$0xff]  ;;  %vm108_vm0 = vcmask 130048   ;;  %vm147_vm1 = vcmask 261120  }
  0x11   :  { %v94_v3 = vld [vmem:[%s730_s0] sm:$0xff]  ;;  %119 = vmatpush.bf16.msra.mxu0 %v441_v1  ;;  %252 = vmatpush.bf16.msra.mxu3 %v449_v2  ;;  %v443_v8 = vld [vmem:[%s734_s4 + $0x8] sm:$0xff]  ;;  %v447_v12 = vld [vmem:[%s736_s6 + $0x18] sm:$0xff]  ;;  %vm202_vm2 = vcmask 523264   ;;  %s571_s0 = smov [#allocation9]   ;;  %s360_s27 = sshll.u32 %s744_s14, 4  ;;  %s361_s27 = int_to_ptr.hbm [resolvable:$true] %s360_s27 }
  0x12   :  { %v95_v4 = vpack.c.bf16 %v94_v3, %v94_v3  ;;  %v448_v5 = vld [vmem:[%s738_s8] sm:$0xff]  ;;  %157 = vmatpush.bf16.msra.mxu1 %v443_v8  ;;  %v451_v10 = vld [vmem:[%s740_s10 + $0x8] sm:$0xff]  ;;  %210 = vmatpush.bf16.msra.mxu2 %v447_v12  ;;  %v446_v13 = vld [vmem:[%s736_s6 + $0x10] sm:$0xff]  ;;  %vm219_vm3 = vcmask 64512   ;;  %vm351_vm4 = vcmask 7168  }
  0x13   :  { %v221_v6 = vld [vmem:[%s731_s1] sm:$0xff]  ;;  %v445_v26 = vld [vmem:[%s736_s6 + $0x8] sm:$0xff]  ;;  %v455_v27 = vld [vmem:[%s742_s12 + $0x18] sm:$0xff] }
  0x14   :  { %379 = vmatmul.msk.bf16.vlgmr.msra.gmra.mxu0 %vm108_vm0, %v95_v4  ;;  %v222_v7 = vpack.c.bf16 %v221_v6, %v221_v6  ;;  %v442_v9 = vld [vmem:[%s734_s4] sm:$0xff]  ;;  %v454_v29 = vld [vmem:[%s742_s12 + $0x10] sm:$0xff]  ;;  %v453_v30 = vld [vmem:[%s742_s12 + $0x8] sm:$0xff] }
  0x15   :  { %253 = vmatpush.bf16.msra.mxu3 %v448_v5  ;;  %290 = vmatpush.bf16.msrb.mxu0 %v451_v10  ;;  %v450_v11 = vld [vmem:[%s740_s10] sm:$0xff] }
  0x16   :  { %158 = vmatpush.bf16.msra.mxu1 %v442_v9  ;;  %211 = vmatpush.bf16.msra.mxu2 %v446_v13  ;;  %v460_v14 = vld [vmem:[#allocation3] ss:$0 sm:$0xff]  ;;  %v461_v19 = vld [vmem:[#allocation6] ss:$0 sm:$0xff]  ;;  %v462_v32 = vld [vmem:[%s735_s5] ss:$0 sm:$0xff] }
  0x17   :  { %v444_v28 = vld [vmem:[%s736_s6] sm:$0xff]  ;;  %s358_s5 = sshll.u32 %s571_s0, 4  ;;  %s359_s5 = int_to_ptr.vmem [resolvable:$true] %s358_s5 }
  0x18   :  { %414 = vmatmul.msk.bf16.vlgmr.msra.gmra.mxu3 %vm147_vm1, %v222_v7  ;;  %v452_v31 = vld [vmem:[%s742_s12] sm:$0xff] }
  0x19   :  { %291 = vmatpush.bf16.msrb.mxu0 %v450_v11  ;;  %v463_v37 = vld [vmem:[#allocation8] ss:$0 sm:$0xff]  ;;  %v464_v44 = vld [vmem:[%s737_s7] ss:$0 sm:$0xff] }
  0x1a   :  { %212 = vmatpush.bf16.msra.mxu2 %v445_v26  ;;  %342 = vmatpush.bf16.msrb.mxu1 %v455_v27  ;;  %v465_v47 = vld [vmem:[#allocation2] ss:$0 sm:$0xff] }
  0x1e   :  { %213 = vmatpush.bf16.msra.mxu2 %v444_v28  ;;  %343 = vmatpush.bf16.msrb.mxu1 %v454_v29 }
  0x22   :  { %344 = vmatpush.bf16.msrb.mxu1 %v453_v30 }
  0x26   :  { %345 = vmatpush.bf16.msrb.mxu1 %v452_v31 }
  0x91   :  { %v121_v15 = vpop.f32.mrf.mxu0 }
  0x92   :  { %v122_v16 = vadd.f32 %v460_v14, %v121_v15 }
  0x94   :  { %v125_v17 = vmax.f32 %v122_v16, 0.0 }
  0x96   :  { %v126_v18 = vpack.c.bf16 %v125_v17, %v125_v17 }
  0x98   :  { %388 = vmatmul.msk.bf16.vlgmr.msra.gmra.mxu1 %vm147_vm1, %v126_v18 }
  0x99   :  { %v123_v20 = vpop.f32.mrf.mxu0 }
  0x9b   :  { %v255_v21 = vpop.f32.mrf.mxu3 }
  0x9c   :  { %v256_v22 = vadd.f32 %v461_v19, %v255_v21 }
  0x9e   :  { %v259_v23 = vmax.f32 %v256_v22, 0.0 }
  0xa0   :  { %v260_v24 = vpack.c.bf16 %v259_v23, %v259_v23 }
  0xa2   :  { %423 = vmatmul.msk.bf16.vlgmr.msrb.gmra.mxu0 %vm147_vm1, %v260_v24 }
  0xa3   :  { %v257_v25 = vpop.f32.mrf.mxu3 }
 0x115   :  { %v160_v33 = vpop.f32.mrf.mxu1 }
 0x116   :  { %v161_v34 = vadd.f32 %v462_v32, %v160_v33 }
 0x118   :  { %v164_v35 = vmax.f32 %v161_v34, 0.0 }
 0x11a   :  { %v165_v36 = vpack.c.bf16 %v164_v35, %v164_v35 }
 0x11c   :  { %405 = vmatmul.msk.bf16.vlgmr.msra.gmra.mxu2 %vm202_vm2, %v165_v36 }
 0x11d   :  { %v162_v38 = vpop.f32.mrf.mxu1 }
 0x11f   :  { %v293_v39 = vpop.f32.mrf.mxu0 }
 0x120   :  { %v294_v40 = vadd.f32 %v463_v37, %v293_v39 }
 0x122   :  { %v297_v41 = vmax.f32 %v294_v40, 0.0 }
 0x124   :  { %v298_v42 = vpack.c.bf16 %v297_v41, %v297_v41 }
 0x126   :  { %440 = vmatmul.msk.bf16.vlgmr.msrb.gmra.mxu1 %vm202_vm2, %v298_v42 }
 0x127   :  { %v295_v43 = vpop.f32.mrf.mxu0 }
 0x19f   :  { %v215_v45 = vpop.f32.mrf.mxu2 }
 0x1a0   :  { %v216_v46 = vadd.f32 %v464_v44, %v215_v45 }
 0x1a2   :  { %220 = vst.msk [vmem:[#allocation9] sm:$0xff] %vm219_vm3, %v216_v46 }
 0x1a3   :  { %v347_v48 = vpop.f32.mrf.mxu1  ;;  %363 = dma.vmem_to_hbm [thread:$0]  %s359_s5, 128, %s361_s27, [#allocation5]  }
 0x1a4   :  { %v348_v49 = vadd.f32 %v465_v47, %v347_v48 }
 0x1a6   :  { %352 = vst.msk [vmem:[%s745_s15] sm:$0xff] %vm351_vm4, %v348_v49 }
 0x1a7   :  { %v217_v50 = vpop.f32.mrf.mxu2 }
 0x1ab   :  { %v349_v51 = vpop.f32.mrf.mxu1 }
 0x1ac   :  { %566 = dma.done.wait [#allocation5], 128  }
 0x1ad   :  { %567 = vsyncadd [#allocation5], 4294967168 }
 0x1ae   :  { %372 = vsyncpa [#allocation4], 1 }
 0x1af   :  { %373 = vsyncpa [#allocation7], 1 }
 0x1b0   :  { %374 = vsyncpa [#allocation5], 1 }

</bundles_post_ra>
